<compile_context>
chip_gen: v6e
topology: v6e:2x2x1
jax: 0.10.0
libtpu: 0.0.40
codegen_flags: <defaults>
</compile_context>

<pallas_src>
import functools

import jax
import jax.numpy as jnp
from jax.experimental import pallas as pl
from jax.experimental.pallas import tpu as pltpu


def _ce_loss_kernel(x_ref, t_ref, acc_ref, *, exp_in_bf16):
    """One (C, S, 128) logits tile -> per-pixel CE partial sums.

    x_ref:   (C, S, 128) logits tile (classes leading, pixels on sublanes x lanes)
    t_ref:   (S, 128)    int32 target tile (-1 marks padded pixels)
    acc_ref: (S, 128)    float32 accumulator (resident across the pixel axis)
    """
    t_axis = pl.program_id(2)

    @pl.when(t_axis == 0)
    def _():
        acc_ref[...] = jnp.zeros_like(acc_ref)

    logits = x_ref[...].astype(jnp.float32)                       # (C, S, 128)
    tgt = t_ref[...]                                              # (S, 128) int32

    # Numerically-stable logsumexp over the (leading) class axis: elementwise
    # VPU max/add across C vregs, no cross-lane/sublane work.
    m = jnp.max(logits, axis=0)                                   # (S, 128)
    shifted = logits - m[None]                                    # (C, S, 128)
    if exp_in_bf16:
        # v7x: bf16 EUP doubles exp throughput; only used when input is bf16.
        e = jnp.exp(shifted.astype(jnp.bfloat16)).astype(jnp.float32)
    else:
        e = jnp.exp(shifted)
    lse = m + jnp.log(jnp.sum(e, axis=0))                         # (S, 128)

    # Target-class logit via iota compare (no dynamic gather on TPU).
    class_ids = jax.lax.broadcasted_iota(jnp.int32, logits.shape, 0)   # (C, S, 128)
    tgt_logit = jnp.sum(jnp.where(class_ids == tgt[None], logits, 0.0), axis=0)

    ce = lse - tgt_logit                                          # (S, 128)
    # Zero out padded pixels (target == -1). Real labels are always >= 0.
    acc_ref[...] += jnp.where(tgt >= 0, ce, 0.0)


def _choose_tile_s(hw128, s_cap):
    """Pick the sublane tile S and (possibly padded) number of 128-pixel rows.

    Returns (S, hw128_padded). S is either the full axis (allowed regardless of
    divisibility) or a multiple of 8 that divides hw128_padded.
    """
    if hw128 <= s_cap:
        return hw128, hw128
    best = None
    s = 8
    while s <= s_cap:
        if hw128 % s == 0:
            best = s
        s += 8
    if best is not None:
        return best, hw128
    # No multiple-of-8 divisor <= cap: pad the row count up to a multiple of 8.
    hw128p = ((hw128 + 7) // 8) * 8
    best = 8
    s = 8
    while s <= s_cap:
        if hw128p % s == 0:
            best = s
        s += 8
    return best, hw128p


def ce_loss_weighted(x, target):
    """x: [N, C, H, W] float logits; target: [N, H, W] integer class ids.

    Returns scalar loss = mean per-pixel cross entropy (weighted=False path).
    """
    N, C, H, W = x.shape
    HW = H * W
    P = N * HW
    x_bytes = jnp.dtype(x.dtype).itemsize

    # Per-generation VMEM budget (v5e/v6e: 128 MiB physical; v7x: 64 MiB).
    try:
        vmem_cap = int(getattr(pltpu.get_tpu_info(), "vmem_capacity_bytes", 64 << 20))
    except Exception:  # conservative default (v7x)
        vmem_cap = 64 << 20
    if vmem_cap >= (96 << 20):
        stream_budget, limit_cap = 28 << 20, 64 << 20
    else:
        stream_budget, limit_cap = 12 << 20, 48 << 20

    # Bytes per (1, 128)-row of pixels: double-buffered logits + targets stream,
    # plus the strip-mined f32 elementwise temporaries and the resident acc.
    per_row = (2 * C * 128 * x_bytes        # double-buffered logits tiles
               + 2 * 128 * 4                # double-buffered target tiles
               + 3 * C * 128 * 4            # f32 cast / shifted / exp temporaries
               + 4 * 128 * 4)               # (S,128) intermediates + accumulator
    s_cap = max(8, (stream_budget // per_row) // 8 * 8)

    hw128 = -(-HW // 128)                   # ceil(HW / 128)
    S, hw128_pad = _choose_tile_s(hw128, s_cap)
    HW_pad = hw128_pad * 128

    # Free reshapes (NCHW is contiguous as [N, C, H*W]); no transpose.
    x3 = x.reshape(N, C, HW)
    t3 = target.reshape(N, HW).astype(jnp.int32)
    if HW_pad > HW:
        # Ragged case only: pad pixels (targets = -1 are masked in-kernel).
        x3 = jnp.pad(x3, ((0, 0), (0, 0), (0, HW_pad - HW)))
        t3 = jnp.pad(t3, ((0, 0), (0, HW_pad - HW)), constant_values=-1)
    x4 = x3.reshape(N, C, hw128_pad, 128)
    t4 = t3.reshape(N, hw128_pad, 128)

    num_s_tiles = hw128_pad // S
    # Pixel super-tile axis so the v7x megacore has work even at N == 1.
    G = 2 if (num_s_tiles >= 2 and num_s_tiles % 2 == 0) else 1
    T = num_s_tiles // G

    working_set = (2 * C * S * 128 * x_bytes
                   + 2 * S * 128 * 4
                   + 3 * C * S * 128 * 4
                   + 2 * S * 128 * 4
                   + (2 << 20))
    vmem_limit = int(min(max(working_set, 16 << 20), limit_cap))

    kernel = functools.partial(_ce_loss_kernel,
                               exp_in_bf16=(x.dtype == jnp.bfloat16))

    acc = pl.pallas_call(
        kernel,
        out_shape=jax.ShapeDtypeStruct((N, G, S, 128), jnp.float32),
        grid_spec=pltpu.PrefetchScalarGridSpec(
            num_scalar_prefetch=0,
            grid=(N, G, T),
            in_specs=[
                pl.BlockSpec((pl.Squeezed(), C, S, 128),
                             lambda n, g, t: (n, 0, g * T + t, 0)),
                pl.BlockSpec((pl.Squeezed(), S, 128),
                             lambda n, g, t: (n, g * T + t, 0)),
            ],
            out_specs=pl.BlockSpec((pl.Squeezed(), pl.Squeezed(), S, 128),
                                   lambda n, g, t: (n, g, 0, 0)),
        ),
        compiler_params=pltpu.CompilerParams(
            dimension_semantics=("parallel", "parallel", "arbitrary"),
            vmem_limit_bytes=vmem_limit,
        ),
    )(x4, t4)

    # weighted=False -> denominator is exactly P (static). Single cross-lane
    # reduction of the per-lane partial sums happens here.
    return (jnp.sum(acc) / jnp.float32(P)).astype(jnp.float32)


def _reference_loss(x, target):
    """Pure-JAX reference of the PyTorch forward (weighted=False)."""
    N, C, H, W = x.shape
    logits = jnp.transpose(x, (0, 2, 3, 1)).reshape(-1, C).astype(jnp.float32)
    tgt = target.reshape(-1).astype(jnp.int32)
    lse = jax.scipy.special.logsumexp(logits, axis=-1)
    tgt_logit = jnp.take_along_axis(logits, tgt[:, None], axis=-1)[:, 0]
    return jnp.mean(lse - tgt_logit)


if __name__ == "__main__":
    key = jax.random.PRNGKey(0)
    k1, k2 = jax.random.split(key)

    N, C, H, W = 2, 4, 16, 16
    x = jax.random.normal(k1, (N, C, H, W), dtype=jnp.float32)
    target = jax.random.randint(k2, (N, H, W), 0, C, dtype=jnp.int32)

    loss = ce_loss_weighted(x, target)
    jax.block_until_ready(loss)

    ref = _reference_loss(x, target)
    assert jnp.allclose(loss, ref, atol=1e-5, rtol=1e-5), (loss, ref)

    print("KERNEL_OK")
</pallas_src>

<mosaic_0001>
module attributes {stable_mosaic.version = 11 : i64} {
  func.func @_ce_loss_kernel(%arg0: i32, %arg1: i32, %arg2: i32, %arg3: memref<1x4x2x128xf32, #tpu.memory_space<vmem>>, %arg4: memref<1x2x128xi32, #tpu.memory_space<vmem>>, %arg5: memref<1x1x2x128xf32, #tpu.memory_space<vmem>>) attributes {dimension_semantics = [#tpu.dimension_semantics<parallel>, #tpu.dimension_semantics<parallel>, #tpu.dimension_semantics<arbitrary>], iteration_bounds = array<i64: 2, 1, 1>, scalar_prefetch = 0 : i64, scratch_operands = 0 : i64, tpu.core_type = #tpu.core_type<tc>, window_params = [{transform_indices = @transform_0, window_bounds = array<i64: 1, 4, 2, 128>}, {transform_indices = @transform_1, window_bounds = array<i64: 1, 2, 128>}, {transform_indices = @transform_2, window_bounds = array<i64: 1, 1, 2, 128>}]} {
    %c0_i32 = arith.constant 0 : i32
    %0 = arith.cmpi eq, %arg2, %c0_i32 : i32
    %1 = arith.extui %0 : i1 to i32
    %c0_i32_0 = arith.constant 0 : i32
    %2 = arith.cmpi ne, %1, %c0_i32_0 : i32
    scf.if %2 {
      %cst_20 = arith.constant 0.000000e+00 : f32
      %33 = vector.broadcast %cst_20 : f32 to vector<2x128xf32>
      %c0_21 = arith.constant 0 : index
      %c0_22 = arith.constant 0 : index
      %c0_23 = arith.constant 0 : index
      %c0_24 = arith.constant 0 : index
      %34 = vector.load %arg5[%c0_21, %c0_22, %c0_23, %c0_24] : memref<1x1x2x128xf32, #tpu.memory_space<vmem>>, vector<1x1x2x128xf32>
      %35 = vector.shape_cast %34 : vector<1x1x2x128xf32> to vector<2x128xf32>
      %36 = vector.shape_cast %33 : vector<2x128xf32> to vector<1x1x2x128xf32>
      tpu.vector_store %arg5[%c0_21, %c0_22, %c0_23, %c0_24], %36 {strides = array<i32>} : memref<1x1x2x128xf32, #tpu.memory_space<vmem>>, vector<1x1x2x128xf32>,
    } else {
    }
    %c0 = arith.constant 0 : index
    %c0_1 = arith.constant 0 : index
    %c0_2 = arith.constant 0 : index
    %c0_3 = arith.constant 0 : index
    %3 = vector.load %arg3[%c0, %c0_1, %c0_2, %c0_3] : memref<1x4x2x128xf32, #tpu.memory_space<vmem>>, vector<1x4x2x128xf32>
    %4 = vector.shape_cast %3 : vector<1x4x2x128xf32> to vector<4x2x128xf32>
    %c0_4 = arith.constant 0 : index
    %c0_5 = arith.constant 0 : index
    %c0_6 = arith.constant 0 : index
    %5 = vector.load %arg4[%c0_4, %c0_5, %c0_6] : memref<1x2x128xi32, #tpu.memory_space<vmem>>, vector<1x2x128xi32>
    %6 = vector.shape_cast %5 : vector<1x2x128xi32> to vector<2x128xi32>
    %cst = arith.constant dense<0xFF800000> : vector<2x128xf32>
    %7 = vector.multi_reduction <maximumf>, %4, %cst [0] : vector<4x2x128xf32> to vector<2x128xf32>
    %8 = vector.shape_cast %7 : vector<2x128xf32> to vector<1x2x128xf32>
    %9 = vector.broadcast %8 : vector<1x2x128xf32> to vector<4x2x128xf32>
    %10 = arith.subf %4, %9 : vector<4x2x128xf32>
    %11 = math.exp %10 : vector<4x2x128xf32>
    %cst_7 = arith.constant dense<0.000000e+00> : vector<2x128xf32>
    %12 = vector.multi_reduction <add>, %11, %cst_7 [0] : vector<4x2x128xf32> to vector<2x128xf32>
    %13 = math.log %12 : vector<2x128xf32>
    %14 = arith.addf %7, %13 : vector<2x128xf32>
    %15 = tpu.iota {dimensions = array<i32: 0>} : vector<4x2x128xi32>
    %16 = vector.shape_cast %6 : vector<2x128xi32> to vector<1x2x128xi32>
    %17 = vector.broadcast %16 : vector<1x2x128xi32> to vector<4x2x128xi32>
    %18 = arith.cmpi eq, %15, %17 : vector<4x2x128xi32>
    %cst_8 = arith.constant 0.000000e+00 : f32
    %19 = vector.broadcast %cst_8 : f32 to vector<4x2x128xf32>
    %20 = arith.select %18, %4, %19 : vector<4x2x128xi1>, vector<4x2x128xf32>
    %cst_9 = arith.constant dense<0.000000e+00> : vector<2x128xf32>
    %21 = vector.multi_reduction <add>, %20, %cst_9 [0] : vector<4x2x128xf32> to vector<2x128xf32>
    %22 = arith.subf %14, %21 : vector<2x128xf32>
    %c0_10 = arith.constant 0 : index
    %c0_11 = arith.constant 0 : index
    %c0_12 = arith.constant 0 : index
    %c0_13 = arith.constant 0 : index
    %23 = vector.load %arg5[%c0_10, %c0_11, %c0_12, %c0_13] : memref<1x1x2x128xf32, #tpu.memory_space<vmem>>, vector<1x1x2x128xf32>
    %24 = vector.shape_cast %23 : vector<1x1x2x128xf32> to vector<2x128xf32>
    %c0_i32_14 = arith.constant 0 : i32
    %25 = vector.broadcast %c0_i32_14 : i32 to vector<2x128xi32>
    %26 = arith.cmpi sge, %6, %25 : vector<2x128xi32>
    %cst_15 = arith.constant 0.000000e+00 : f32
    %27 = vector.broadcast %cst_15 : f32 to vector<2x128xf32>
    %28 = arith.select %26, %22, %27 : vector<2x128xi1>, vector<2x128xf32>
    %29 = arith.addf %24, %28 : vector<2x128xf32>
    %c0_16 = arith.constant 0 : index
    %c0_17 = arith.constant 0 : index
    %c0_18 = arith.constant 0 : index
    %c0_19 = arith.constant 0 : index
    %30 = vector.load %arg5[%c0_16, %c0_17, %c0_18, %c0_19] : memref<1x1x2x128xf32, #tpu.memory_space<vmem>>, vector<1x1x2x128xf32>
    %31 = vector.shape_cast %30 : vector<1x1x2x128xf32> to vector<2x128xf32>
    %32 = vector.shape_cast %29 : vector<2x128xf32> to vector<1x1x2x128xf32>
    tpu.vector_store %arg5[%c0_16, %c0_17, %c0_18, %c0_19], %32 {strides = array<i32>} : memref<1x1x2x128xf32, #tpu.memory_space<vmem>>, vector<1x1x2x128xf32>,
    return
  }
  func.func @transform_0(%arg0: i32, %arg1: i32, %arg2: i32) -> (i32, i32, i32, i32) {
    %c1_i32 = arith.constant 1 : i32
    %0 = arith.muli %arg1, %c1_i32 : i32
    %1 = arith.addi %0, %arg2 : i32
    %c0_i32 = arith.constant 0 : i32
    %c0_i32_0 = arith.constant 0 : i32
    %c0_i32_1 = arith.constant 0 : i32
    return %arg0, %c0_i32, %1, %c0_i32_0 : i32, i32, i32, i32
  }
  func.func @transform_1(%arg0: i32, %arg1: i32, %arg2: i32) -> (i32, i32, i32) {
    %c1_i32 = arith.constant 1 : i32
    %0 = arith.muli %arg1, %c1_i32 : i32
    %1 = arith.addi %0, %arg2 : i32
    %c0_i32 = arith.constant 0 : i32
    %c0_i32_0 = arith.constant 0 : i32
    return %arg0, %1, %c0_i32 : i32, i32, i32
  }
  func.func @transform_2(%arg0: i32, %arg1: i32, %arg2: i32) -> (i32, i32, i32, i32) {
    %c0_i32 = arith.constant 0 : i32
    %c0_i32_0 = arith.constant 0 : i32
    %c0_i32_1 = arith.constant 0 : i32
    return %arg0, %arg1, %c0_i32, %c0_i32_0 : i32, i32, i32, i32
  }
}

</mosaic_0001>

<bundles_post_ra>
// kernel: tpu_custom_call.1
= control target key start
LH: loop header
LB: loop body
LE: loop exit
PB: predicated region body
PF: predicated region fallthrough
CT: control target
= control target key end

     0   :  { %7 = vsyncpa [#allocation3], 0  ;;  %s864_s0 = inlined_call_operand.hbm [shape: f32[2,4,2,128], index: 0, kind: input, shape index: {}]   ;;  %s865_s1 = inlined_call_operand.hbm [shape: s32[2,2,128], index: 1, kind: input, shape index: {}]   ;;  %s866_s2 = inlined_call_operand.hbm [shape: f32[2,1,2,128], index: 2, kind: output, shape index: {}]  }
   0x1   :  { %9 = vsyncpa [#allocation3 + $0x1], 0 }
   0x2   :  { %10 = vsyncpa [#allocation6], 0 }
   0x3   :  { %12 = vsyncpa [#allocation6 + $0x1], 0 }
   0x4   :  { %13 = vsyncpa [#allocation4], 0 }
   0x5   :  { %15 = vsyncpa [#allocation4 + $0x1], 0  ;;  %s681_s9 = smov 0   ;;  %s683_s10 = smov 0  }
   0x6   :  { %s685_s11 = smov 0   ;;  %s687_s12 = smov 0  }
   0x7   :  { %s689_s13 = smov 0   ;;  %s691_s14 = smov 0  }
   0x8 LB: > { %s420_s15 = sadd.s32 4294967295, %s658_s14   ;;  %s421_s16 = sadd.s32 4294967294, %s658_s14   ;;  %s658_s14 = sphi %s691_s14, %s21_s14   ;;  %s654_s13 = sphi %s689_s13, %s878_s13   ;;  %s650_s12 = sphi %s687_s12, %s877_s12   ;;  %s646_s11 = sphi %s685_s11, %s876_s11   ;;  %s642_s10 = sphi %s683_s10, %s875_s10   ;;  %s638_s9 = sphi %s681_s9, %s874_s9  }
   0x9   : > { %s40_s17 = sadd.s32 1, %s654_s13  ;;  %s51_s18 = sadd.s32 1, %s646_s11 }
   0xa   : > { %p42_p0 = scmp.ge.s32.totalorder %s40_s17, 2  ;;  %p58_p1 = scmp.ne.s32.totalorder %s646_s11, %s642_s10 }
   0xb   : > { %p59_p2 = scmp.eq.s32.totalorder %s658_s14, 0  ;;  %p64_p3 = scmp.ne.s32.totalorder %s642_s10, %s638_s9 }
   0xc   : > { %s880_s17 = smov (%p42_p0, %s40_s17), 0  ;;  %p65_p5 = scmp.eq.s32.totalorder %s420_s15, 0 }
   0xd   : > { %p722_p4 = por %p59_p2, %p58_p1  ;;  %s46_s20 = ssub.s32 %s654_s13, %s880_s17 }
   0xe   : > { %p120_p6 = scmp.eq.s32.totalorder %s420_s15, 1  ;;  %p49_p7 = scmp.eq.s32.totalorder %s46_s20, 0 }
   0xf   : > { %p728_p8 = por %p65_p5, %p64_p3  ;;  %p126_p10 = scmp.eq.s32.totalorder %s421_s16, 1 }
  0x10   : > { %p732_p9 = por %p120_p6, %p58_p1  ;;  %p455_p13 = scmp.lt.s32.totalorder %s658_s14, 2 }
  0x11   : > { %s737_s23 = scalar_select %p49_p7, %s646_s11, %s51_s18  }
  0x12   : > { %p739_p11 = por %p126_p10, %p64_p3  ;;  %s746_s25 = sand.u32 1, %s646_s11  }
  0x13   : > { %s424_s26 = sshll.u32 %s746_s25, 3  ;;  %s437_s27 = sshll.u32 %s654_s13, 7 }
  0x14   : > { %s158_s30 = scalar_lea.hbm %s864_s0, %s437_s27  ;;  %s150_s3 = scalar_lea.vmem [#allocation2], %s424_s26 }
  0x15   : > { %s159_s4 = sshll.u32 %s150_s3, 4  ;;  %p755_p0 = pnand %p455_p13, %p722_p4  ;;  %s160_s4 = int_to_ptr.vmem [resolvable:$true] %s159_s4 }
  0x16   : > { %p429_p1 = scmp.ge.s32.totalorder %s658_s14, 1  ;;  %s147_s6 = scalar_lea.sflag [#allocation3], %s746_s25 }
  0x17   : > { %p520_p2 = pneg %p755_p0  ;;  %s531_s7 = scalar_lea.vmem %s160_s4, 128 }
  0x18   : > { %p532_p3 = scmp.ne.s32.totalorder %s160_s4, %s531_s7  ;;  %s660_s8 = smov [#allocation2]  }
  0x19   : > { %s536_s15 = sshll.u32 %s660_s8, 4  ;;  %s537_s15 = int_to_ptr.vmem [resolvable:$false] %s536_s15 }
  0x1a   : > { %p534_p5 = pnand %p532_p3, %p520_p2  ;;  %s538_s16 = scalar_lea.vmem %s537_s15, 256 }
  0x1b   : > { %p539_p4 = scmp.lt.s32.totalorder %s160_s4, %s537_s15  ;;  %p540_p7 = scmp.lt.s32.totalorder %s538_s16, %s531_s7 }
  0x1c   : > { %p535_p6 = pneg %p534_p5 }
  0x1d   : > { %p541_p10 = por %p540_p7, %p539_p4 }
  0x1f   : > { %p542_p13 = pnand %p541_p10, %p535_p6 }
  0x21   : > { %545 = shalt.err (!%p542_p13)
}
  0x22   : > { %s661_s18 = smov 32   ;;  %s662_s19 = smov 2  }
  0x23   : > { %447 = dma.hbm_to_vmem [thread:$0]  (!%p755_p0), %s158_s30, 128, %s160_s4, %s147_s6, %s661_s18, %s661_s18, %s662_s19  }
  0x24   : > { %p187_p3 = scmp.lt.s32.totalorder %s658_s14, 3  ;;  %s427_s20 = sshll.u32 %s746_s25, 1 }
  0x25   : > { %s428_s26 = sshll.u32 %s654_s13, 5  ;;  %s173_s7 = scalar_lea.vmem [#allocation5], %s427_s20 }
  0x26   : > { %p773_p5 = pnand %p429_p1, %p187_p3  ;;  %s180_s3 = scalar_lea.hbm %s865_s1, %s428_s26 }
  0x27   : > { %s182_s8 = sshll.u32 %s173_s7, 4  ;;  %s170_s15 = scalar_lea.sflag [#allocation6], %s746_s25  ;;  %s183_s8 = int_to_ptr.vmem [resolvable:$true] %s182_s8 }
  0x28   : > { %s559_s16 = scalar_lea.vmem %s183_s8, 32  ;;  %s663_s30 = smov [#allocation5]  }
  0x29   : > { %p560_p6 = scmp.ne.s32.totalorder %s183_s8, %s559_s16  ;;  %s564_s4 = sshll.u32 %s663_s30, 4  ;;  %s565_s4 = int_to_ptr.vmem [resolvable:$false] %s564_s4 }
  0x2a   : > { %s566_s6 = scalar_lea.vmem %s565_s4, 64  ;;  %p567_p1 = scmp.lt.s32.totalorder %s183_s8, %s565_s4 }
  0x2b   : > { %p562_p4 = pnand %p560_p6, %p520_p2  ;;  %p568_p10 = scmp.lt.s32.totalorder %s566_s6, %s559_s16 }
  0x2d   : > { %p563_p7 = pneg %p562_p4  ;;  %p569_p13 = por %p568_p10, %p567_p1 }
  0x2f   : > { %p570_p3 = pnand %p569_p13, %p563_p7 }
  0x31   : > { %573 = shalt.err (!%p570_p3)
}
  0x32   : > { %450 = dma.hbm_to_vmem [thread:$0]  (!%p755_p0), %s180_s3, 32, %s183_s8, %s170_s15  }
  0x33   : > { %191 = sbr.rel (%p773_p5) target bundleno = 130 (0x82), region = 28  ;;  %s789_s25 = sand.u32 (!%p773_p5), 1, %s642_s10  }
  0x34   : > { %s430_s18 = sshll.u32 (!%p773_p5), %s789_s25, 3  ;;  %s194_s19 = scalar_lea.sflag (!%p773_p5), [#allocation3], %s789_s25 }
  0x35   : > { %s197_s20 = scalar_lea.vmem (!%p773_p5), [#allocation2], %s430_s18 }
  0x38   : > { %625 = dma.done.wait (%p728_p8), %s194_s19, 128  }
  0x39   : > { %627 = vsyncadd (%p728_p8), %s194_s19, 4294967168  ;;  %s431_s5 = sshll.u32 %s789_s25, 1  ;;  %s203_s26 = scalar_lea.sflag [#allocation6], %s789_s25 }
  0x3a   : > { %s799_s27 = scalar_lea.vmem [#allocation5], %s431_s5 }
  0x3b   : > { %629 = dma.done.wait (%p728_p8), %s203_s26, 32  }
  0x3c   : > { %631 = vsyncadd (%p728_p8), %s203_s26, 4294967264  ;;  %s805_s28 = scalar_lea.vmem [#allocation7], %s431_s5  ;;  %v664_v0 = vmov 0.0   ;;  %vm244_vm0 = vcmask 1041408   ;;  %v239_v1 = vld [vmem:[%s197_s20] sm:$0x3] }
  0x3d   : > { %238 = vst [vmem:[%s805_s28] sm:$0x3] %v664_v0  ;;  %v240_v2 = vld [vmem:[%s197_s20 + $0x2] sm:$0x3]  ;;  %v241_v3 = vld [vmem:[%s197_s20 + $0x4] sm:$0x3]  ;;  %v245_v5 = vsel %vm244_vm0, %v239_v1, -inf }
  0x3e   : > { %v242_v4 = vld [vmem:[%s197_s20 + $0x6] sm:$0x3]  ;;  %v246_v6 = vsel %vm244_vm0, %v240_v2, -inf  ;;  %v247_v7 = vsel %vm244_vm0, %v241_v3, -inf  ;;  %v243_v26 = vld [vmem:[%s799_s27] sm:$0x3] }
  0x3f   : > { %v248_v8 = vsel %vm244_vm0, %v242_v4, -inf  ;;  %v249_v9 = vmax.f32 %v245_v5, %v246_v6  ;;  %vm274_vm1 = vcmp.eq.s32.totalorder %v243_v26, 0  ;;  %vm275_vm2 = vcmp.eq.s32.totalorder %v243_v26, 1  ;;  %s434_s21 = sshll.u32 %s650_s12, 5  ;;  %s310_s29 = sshll.u32 %s805_s28, 4  ;;  %s311_s29 = int_to_ptr.vmem [resolvable:$true] %s310_s29 }
  0x40   : > { %v250_v10 = vmax.f32 %v247_v7, %v248_v8  ;;  %v278_v32 = vsel %vm274_vm1, %v239_v1, 0.0  ;;  %v279_v33 = vsel %vm275_vm2, %v240_v2, 0.0  ;;  %vm276_vm3 = vcmp.eq.s32.totalorder %v243_v26, 2  ;;  %s308_s8 = scalar_lea.hbm %s866_s2, %s434_s21  ;;  %s296_s15 = scalar_lea.sflag [#allocation4], %s789_s25 }
  0x41   : > { %v282_v34 = vsel %vm244_vm0, %v278_v32, 0.0  ;;  %v283_v35 = vsel %vm244_vm0, %v279_v33, 0.0  ;;  %v280_v36 = vsel %vm276_vm3, %v241_v3, 0.0  ;;  %vm277_vm4 = vcmp.eq.s32.totalorder %v243_v26, 3  ;;  %s574_s16 = scalar_lea.vmem %s311_s29, 32  ;;  %s665_s30 = smov [#allocation7]  }
  0x42   : > { %v251_v11 = vmax.f32 %v249_v9, %v250_v10  ;;  %v284_v37 = vadd.f32 %v283_v35, %v282_v34  ;;  %v285_v38 = vsel %vm244_vm0, %v280_v36, 0.0  ;;  %v281_v39 = vsel %vm277_vm4, %v242_v4, 0.0  ;;  %p575_p8 = scmp.ne.s32.totalorder %s311_s29, %s574_s16  ;;  %s578_s4 = sshll.u32 %s665_s30, 4  ;;  %s579_s4 = int_to_ptr.vmem [resolvable:$false] %s578_s4 }
  0x43   : > { %v287_v41 = vsel %vm244_vm0, %v281_v39, 0.0  ;;  %vm291_vm5 = vcmp.ge.s32.totalorder %v243_v26, 0  ;;  %s580_s6 = scalar_lea.vmem %s579_s4, 64  ;;  %p581_p5 = scmp.lt.s32.totalorder %s311_s29, %s579_s4 }
  0x44   : > { %v252_v12 = vsub.f32 %v239_v1, %v251_v11  ;;  %v253_v13 = vsub.f32 %v240_v2, %v251_v11  ;;  %v254_v14 = vsub.f32 %v241_v3, %v251_v11  ;;  %v255_v15 = vsub.f32 %v242_v4, %v251_v11  ;;  %v290_v47 = vld [vmem:[%s805_s28] sm:$0x3]  ;;  %p576_p0 = pnand %p575_p8, %p732_p9  ;;  %p582_p6 = scmp.lt.s32.totalorder %s580_s6, %s574_s16 }
  0x45   : > { %v286_v40 = vadd.f32 %v285_v38, %v284_v37 }
  0x46   : > { %v256_v16 = vmul.f32 1.442695, %v252_v12  ;;  %v258_v17 = vmul.f32 1.442695, %v253_v13  ;;  %v260_v18 = vmul.f32 1.442695, %v254_v14  ;;  %p577_p2 = pneg %p576_p0  ;;  %p583_p4 = por %p582_p6, %p581_p5 }
  0x47   : > { %v262_v19 = vmul.f32 1.442695, %v255_v15  ;;  %v288_v44 = vadd.f32 %v287_v41, %v286_v40 }
  0x48   : > { %508 = vpow2.f32 %v256_v16  ;;  %p584_p7 = pnand %p583_p4, %p577_p2 }
  0x49   : > { %510 = vpow2.f32 %v258_v17 }
  0x4a   : > { %512 = vpow2.f32 %v260_v18 }
  0x4b   : > { %514 = vpow2.f32 %v262_v19 }
  0x55   : > { %v509_v20 = vpop.eup %508 }
  0x56   : > { %v511_v21 = vpop.eup %510  ;;  %v264_v22 = vsel %vm244_vm0, %v509_v20, 0.0 }
  0x57   : > { %v513_v23 = vpop.eup %512  ;;  %v265_v24 = vsel %vm244_vm0, %v511_v21, 0.0 }
  0x58   : > { %v515_v25 = vpop.eup %514  ;;  %v266_v27 = vadd.f32 %v265_v24, %v264_v22  ;;  %v267_v28 = vsel %vm244_vm0, %v513_v23, 0.0 }
  0x59   : > { %v269_v29 = vsel %vm244_vm0, %v515_v25, 0.0 }
  0x5a   : > { %v268_v30 = vadd.f32 %v267_v28, %v266_v27 }
  0x5c   : > { %v270_v31 = vadd.f32 %v269_v29, %v268_v30 }
  0x5e   : > { %516 = vlog2.f32 %v270_v31 }
  0x6b   : > { %v517_v42 = vpop.eup %516 }
  0x6c   : > { %v272_v43 = vmul.f32 0.6931472, %v517_v42 }
  0x6e   : > { %v273_v45 = vadd.f32 %v272_v43, %v251_v11 }
  0x70   : > { %v289_v46 = vsub.f32 %v273_v45, %v288_v44 }
  0x72   : > { %v292_v48 = vsel %vm291_vm5, %v289_v46, 0.0 }
  0x73   : > { %v293_v49 = vadd.f32 %v292_v48, %v290_v47 }
  0x75   : > { %294 = vst [vmem:[%s805_s28] sm:$0x3] %v293_v49 }
  0x76   : > { %587 = shalt.err (!%p584_p7)
}
  0x77   : > { %s588_s12 = scalar_lea.hbm %s308_s8, 32  ;;  %s592_s19 = scalar_lea.hbm %s866_s2, 64 }
  0x78   : > { %p589_p1 = scmp.ne.s32.totalorder %s308_s8, %s588_s12  ;;  %p593_p3 = scmp.lt.s32.totalorder %s308_s8, %s866_s2 }
  0x79   : > { %p594_p8 = scmp.lt.s32.totalorder %s592_s19, %s588_s12 }
  0x7a   : > { %p590_p10 = pnand %p589_p1, %p732_p9 }
  0x7b   : > { %p595_p0 = por %p594_p8, %p593_p3 }
  0x7c   : > { %p591_p13 = pneg %p590_p10 }
  0x7e   : > { %p596_p12 = pnand %p595_p0, %p591_p13 }
  0x80   : > { %599 = shalt.err (!%p596_p12)
}
  0x81   : > { %442 = dma.vmem_to_hbm [thread:$0]  (%p732_p9), %s311_s29, 32, %s308_s8, %s296_s15  }
  0x82 PF: > { %s322_s26 = sand.u32 1, %s638_s9   ;;  %p873_p2 = scmp.ge.s32.totalorder %s658_s14, 2 }
  0x83   : > { %s323_s27 = scalar_lea.sflag [#allocation4], %s322_s26 }
  0x84   : > { %p452_p5 = pnand %p873_p2, %p739_p11 }
  0x86   : > { %p453_p6 = pneg %p452_p5 }
  0x88   : > { %633 = dma.done.wait (%p453_p6), %s323_s27, 32  }
  0x89   : > { %635 = vsyncadd (%p453_p6), %s323_s27, 4294967264  ;;  %s21_s14 = sadd.s32 1, %s658_s14   ;;  %s874_s9 = smov %s642_s10 }
  0x8a   : > { %p18_p4 = scmp.ge.s32.totalorder %s21_s14, 4   ;;  %s875_s10 = smov %s646_s11 }
  0x8b   : > { %s876_s11 = smov %s737_s23  ;;  %s877_s12 = smov %s654_s13 }
  0x8c   : > { %s878_s13 = smov %s880_s17  ;;  %20 = sbr.rel (!%p18_p4) target bundleno = 8 (0x8), region = 90 }
  0x91   :  { %328 = vsyncpa [#allocation3], 1 }
  0x92   :  { %330 = vsyncpa [#allocation3 + $0x1], 1 }
  0x93   :  { %331 = vsyncpa [#allocation6], 1 }
  0x94   :  { %333 = vsyncpa [#allocation6 + $0x1], 1 }
  0x95   :  { %334 = vsyncpa [#allocation4], 1 }
  0x96   :  { %336 = vsyncpa [#allocation4 + $0x1], 1 }

</bundles_post_ra>
